<compile_context>
chip_gen: v6e
topology: v6e:2x2x1
jax: 0.10.0
libtpu: 0.0.40
codegen_flags: <defaults>
</compile_context>

<pallas_src>
import math
import jax
import jax.numpy as jnp
from jax.experimental import pallas as pl
from jax.experimental.pallas import tpu as pltpu


_LANE = 128
_SUBLANE = 8
_PARAM_PAD = 256   # pad H / I to multiples of this -> >=256-wide tiles always divide


def _round_up(x, m):
    return ((x + m - 1) // m) * m


def _pick_tile(total, cap, quantum):
    """Largest tile <= cap that is a multiple of `quantum` and divides `total`
    (total must already be a multiple of quantum)."""
    t = min(cap, total)
    t = (t // quantum) * quantum
    while total % t != 0:
        t -= quantum
    return t


def _vmem_limit_bytes():
    """Generation-aware scoped-VMEM limit: ~48 MiB on v7x (64 MiB physical),
    ~96 MiB on v5e/v6e (128 MiB physical)."""
    try:
        cap = pltpu.get_tpu_info().vmem_capacity_bytes
    except Exception:
        cap = 128 * 1024 * 1024
    return int(min((cap * 3) // 4, 96 * 1024 * 1024))


def _pad_to(x, shape):
    """Cast to f32 and zero-pad up to `shape`; skipped when already aligned."""
    x = x.astype(jnp.float32)
    if tuple(x.shape) == tuple(shape):
        return x
    return jnp.pad(x, [(0, t - s) for s, t in zip(x.shape, shape)])


# ----------------------------------------------------------------------------
# One-time parameter preparation (transpose / pad / pack) — NOT per call.
# ----------------------------------------------------------------------------
def prepare_params(weight_ih, weight_hh, bias_ih):
    """weight_ih:(H,I) -> w_iht:(Ip,Hp) pre-transposed + padded (lane-dense);
    weight_hh:(H,), bias_ih:(H,) -> whb:(8,Hp) packed (row0=w_hh, row1=b_ih)."""
    H, I = weight_ih.shape
    Ip = _round_up(I, _PARAM_PAD)
    Hp = _round_up(H, _PARAM_PAD)
    w_iht = jnp.zeros((Ip, Hp), jnp.float32).at[:I, :H].set(
        weight_ih.T.astype(jnp.float32))
    whb = jnp.zeros((_SUBLANE, Hp), jnp.float32)
    whb = whb.at[0, :H].set(weight_hh.astype(jnp.float32))
    whb = whb.at[1, :H].set(bias_ih.astype(jnp.float32))
    return w_iht, whb


# ----------------------------------------------------------------------------
# Single cell step (matches IndRNNCell.forward)
# ----------------------------------------------------------------------------
def _cell_kernel_fullk(x_ref, h_ref, w_ref, whb_ref, o_ref):
    # Full-K block: no accumulator / K-phase logic (weight-streaming bound at
    # small batch, so fewer/larger grid steps win).
    w_hh = whb_ref[0:1, :]      # (1, th), broadcasts over batch
    b_ih = whb_ref[1:2, :]
    pre = jnp.dot(x_ref[...], w_ref[...], preferred_element_type=jnp.float32)
    # TODO(synk): 'tanh' nonlinearity branch of the module is not wired up.
    o_ref[...] = jnp.maximum(pre + b_ih + w_hh * h_ref[...], 0.0).astype(o_ref.dtype)


def _cell_kernel_acc(x_ref, h_ref, w_ref, whb_ref, o_ref, acc_ref):
    # Fallback path for large input_size (K tiled, reduction axis last).
    k = pl.program_id(2)

    @pl.when(k == 0)
    def _():
        acc_ref[...] = jnp.zeros_like(acc_ref)

    acc_ref[...] += jnp.dot(x_ref[...], w_ref[...],
                            preferred_element_type=jnp.float32)

    @pl.when(k == pl.num_programs(2) - 1)
    def _():
        w_hh = whb_ref[0:1, :]
        b_ih = whb_ref[1:2, :]
        pre = acc_ref[...] + b_ih + w_hh * h_ref[...]
        o_ref[...] = jnp.maximum(pre, 0.0).astype(o_ref.dtype)


def indrnn_cell_forward(x, hx, w_iht, whb, hidden_size):
    """relu(x @ W_ih.T + b_ih + w_hh * hx) with prepared params."""
    B, I = x.shape
    Ip, Hp = w_iht.shape
    Bp = _round_up(B, _SUBLANE)

    xp = _pad_to(x, (Bp, Ip))
    hp = _pad_to(hx, (Bp, Hp))

    tb = _pick_tile(Bp, 256, _SUBLANE)
    vmem = _vmem_limit_bytes()

    if Ip <= 1024:
        # Single K block: 2-D parallel grid, no accumulator scratch.
        th = _pick_tile(Hp, 1024, _LANE)
        out = pl.pallas_call(
            _cell_kernel_fullk,
            out_shape=jax.ShapeDtypeStruct((Bp, Hp), jnp.float32),
            grid_spec=pltpu.PrefetchScalarGridSpec(
                num_scalar_prefetch=0,
                grid=(Bp // tb, Hp // th),
                in_specs=[
                    pl.BlockSpec((tb, Ip), lambda i, j: (i, 0)),        # x (full K)
                    pl.BlockSpec((tb, th), lambda i, j: (i, j)),        # h
                    pl.BlockSpec((Ip, th), lambda i, j: (0, j)),        # W_ih^T
                    pl.BlockSpec((_SUBLANE, th), lambda i, j: (0, j)),  # w_hh/b_ih
                ],
                out_specs=pl.BlockSpec((tb, th), lambda i, j: (i, j)),
            ),
            compiler_params=pltpu.CompilerParams(
                dimension_semantics=("parallel", "parallel"),
                vmem_limit_bytes=vmem),
        )(xp, hp, w_iht, whb)
    else:
        th = _pick_tile(Hp, 512, _LANE)
        tk = _pick_tile(Ip, 1024, _LANE)
        out = pl.pallas_call(
            _cell_kernel_acc,
            out_shape=jax.ShapeDtypeStruct((Bp, Hp), jnp.float32),
            grid_spec=pltpu.PrefetchScalarGridSpec(
                num_scalar_prefetch=0,
                grid=(Bp // tb, Hp // th, Ip // tk),
                in_specs=[
                    pl.BlockSpec((tb, tk), lambda i, j, k: (i, k)),
                    pl.BlockSpec((tb, th), lambda i, j, k: (i, j)),
                    pl.BlockSpec((tk, th), lambda i, j, k: (k, j)),
                    pl.BlockSpec((_SUBLANE, th), lambda i, j, k: (0, j)),
                ],
                out_specs=pl.BlockSpec((tb, th), lambda i, j, k: (i, j)),
                scratch_shapes=[pltpu.VMEM((tb, th), jnp.float32)],
            ),
            compiler_params=pltpu.CompilerParams(
                dimension_semantics=("parallel", "parallel", "arbitrary"),
                vmem_limit_bytes=vmem),
        )(xp, hp, w_iht, whb)

    return out[:B, :hidden_size]


# ----------------------------------------------------------------------------
# Sequence runner: one big GEMM for the input projection + a chunked, tiled
# recurrence with the hidden state resident in VMEM.
# ----------------------------------------------------------------------------
def _matmul_kernel(a_ref, b_ref, o_ref, acc_ref):
    @pl.when(pl.program_id(2) == 0)
    def _():
        acc_ref[...] = jnp.zeros_like(acc_ref)

    acc_ref[...] += jnp.dot(a_ref[...], b_ref[...],
                            preferred_element_type=jnp.float32)

    @pl.when(pl.program_id(2) == pl.num_programs(2) - 1)
    def _():
        o_ref[...] = acc_ref[...].astype(o_ref.dtype)


def _recurrence_kernel(lin_ref, h0_ref, whb_ref, o_ref, h_scr):
    # Grid = (batch tiles, hidden tiles, T chunks); T chunks are last &
    # sequential, hidden state carried per (batch, hidden) tile in VMEM scratch.
    @pl.when(pl.program_id(2) == 0)
    def _():
        h_scr[...] = h0_ref[...]

    tile = (lin_ref.shape[1], lin_ref.shape[2])
    # Hoisted above the timestep loop (JAX does not CSE broadcast_in_dim).
    w_hh = jnp.broadcast_to(whb_ref[0:1, :], tile)
    b_ih = jnp.broadcast_to(whb_ref[1:2, :], tile)

    def step(s, h):
        h_new = jnp.maximum(lin_ref[s] + b_ih + w_hh * h, 0.0)
        o_ref[s] = h_new.astype(o_ref.dtype)
        return h_new

    h_scr[...] = jax.lax.fori_loop(0, lin_ref.shape[0], step, h_scr[...],
                                   unroll=True)


def indrnn_sequence_forward(xs, h0, w_iht, whb, hidden_size, *, tt_chunk=16):
    """Apply the cell over xs:(T,B,I) starting at h0:(B,H). Returns (T,B,H)."""
    T, B, I = xs.shape
    Ip, Hp = w_iht.shape
    Bp = _round_up(B, _SUBLANE)
    TT = min(tt_chunk, T)
    Tp = _round_up(T, TT)

    xs_p = _pad_to(xs, (Tp, Bp, Ip))
    h0_p = _pad_to(h0, (Bp, Hp))

    vmem = _vmem_limit_bytes()
    Mp = Tp * Bp

    # Phase 1: h-independent input projection for all timesteps as one GEMM.
    tm = _pick_tile(Mp, 512, _SUBLANE)
    th = _pick_tile(Hp, 1024, _LANE)
    tk = _pick_tile(Ip, 1024, _LANE)
    lin = pl.pallas_call(
        _matmul_kernel,
        out_shape=jax.ShapeDtypeStruct((Mp, Hp), jnp.float32),
        grid_spec=pltpu.PrefetchScalarGridSpec(
            num_scalar_prefetch=0,
            grid=(Mp // tm, Hp // th, Ip // tk),
            in_specs=[
                pl.BlockSpec((tm, tk), lambda i, j, k: (i, k)),
                pl.BlockSpec((tk, th), lambda i, j, k: (k, j)),
            ],
            out_specs=pl.BlockSpec((tm, th), lambda i, j, k: (i, j)),
            scratch_shapes=[pltpu.VMEM((tm, th), jnp.float32)],
        ),
        compiler_params=pltpu.CompilerParams(
            dimension_semantics=("parallel", "parallel", "arbitrary"),
            vmem_limit_bytes=vmem),
    )(xs_p.reshape(Mp, Ip), w_iht)
    lin = lin.reshape(Tp, Bp, Hp)

    # Phase 2: chunked recurrence. w_hh is diagonal, so the recurrence is
    # independent per (batch row, hidden unit) -> batch/hidden axes "parallel";
    # only the T-chunk axis is sequential ("arbitrary", last).
    tb2 = _pick_tile(Bp, 128, _SUBLANE)
    th2 = _pick_tile(Hp, 512, _LANE)
    hs = pl.pallas_call(
        _recurrence_kernel,
        out_shape=jax.ShapeDtypeStruct((Tp, Bp, Hp), jnp.float32),
        grid_spec=pltpu.PrefetchScalarGridSpec(
            num_scalar_prefetch=0,
            grid=(Bp // tb2, Hp // th2, Tp // TT),
            in_specs=[
                pl.BlockSpec((TT, tb2, th2), lambda i, j, t: (t, i, j)),   # lin chunk
                pl.BlockSpec((tb2, th2), lambda i, j, t: (i, j)),          # h0 (resident)
                pl.BlockSpec((_SUBLANE, th2), lambda i, j, t: (0, j)),     # w_hh/b_ih
            ],
            out_specs=pl.BlockSpec((TT, tb2, th2), lambda i, j, t: (t, i, j)),
            scratch_shapes=[pltpu.VMEM((tb2, th2), jnp.float32)],
        ),
        compiler_params=pltpu.CompilerParams(
            dimension_semantics=("parallel", "parallel", "arbitrary"),
            vmem_limit_bytes=vmem),
    )(lin, h0_p, whb)

    return hs[:T, :B, :hidden_size]


# ----------------------------------------------------------------------------
# Parameter init mirroring IndRNNCell.reset_parameters()
# ----------------------------------------------------------------------------
def init_params(key, input_size, hidden_size):
    k_ih, k_hh = jax.random.split(key)
    stdv = 1.0 / math.sqrt(hidden_size)
    weight_ih = 0.01 * jax.random.normal(
        k_ih, (hidden_size, input_size), jnp.float32)
    weight_hh = jax.random.uniform(
        k_hh, (hidden_size,), jnp.float32, minval=-stdv, maxval=stdv)
    bias_ih = jnp.zeros((hidden_size,), jnp.float32)
    return weight_ih, weight_hh, bias_ih


if __name__ == "__main__":
    B, INPUT_SIZE, HIDDEN_SIZE, SEQ = 2, 16, 32, 8

    key = jax.random.PRNGKey(0)
    k_x, k_h, k_p, k_s = jax.random.split(key, 4)

    x = jax.random.normal(k_x, (B, INPUT_SIZE), jnp.float32)
    hx = jax.random.normal(k_h, (B, HIDDEN_SIZE), jnp.float32)
    xs = jax.random.normal(k_s, (SEQ, B, INPUT_SIZE), jnp.float32)
    weight_ih, weight_hh, bias_ih = init_params(k_p, INPUT_SIZE, HIDDEN_SIZE)

    # One-time parameter preparation (transpose / pad / pack).
    w_iht, whb = prepare_params(weight_ih, weight_hh, bias_ih)

    # --- single cell step (== IndRNNCell.forward) ---
    out = indrnn_cell_forward(x, hx, w_iht, whb, HIDDEN_SIZE)
    out = jax.block_until_ready(out)

    ref = jax.nn.relu(x @ weight_ih.T + bias_ih + weight_hh * hx)
    assert out.shape == (B, HIDDEN_SIZE)
    assert jnp.allclose(out, ref, atol=1e-4, rtol=1e-4), \
        float(jnp.max(jnp.abs(out - ref)))

    # --- fused sequence (repeated application of the same cell) ---
    hs = indrnn_sequence_forward(xs, hx, w_iht, whb, HIDDEN_SIZE)
    hs = jax.block_until_ready(hs)

    def _ref_step(h, x_t):
        h = jax.nn.relu(x_t @ weight_ih.T + bias_ih + weight_hh * h)
        return h, h

    _, hs_ref = jax.lax.scan(_ref_step, hx, xs)
    assert hs.shape == (SEQ, B, HIDDEN_SIZE)
    assert jnp.allclose(hs, hs_ref, atol=1e-4, rtol=1e-4), \
        float(jnp.max(jnp.abs(hs - hs_ref)))

    print("KERNEL_OK")
</pallas_src>

<mosaic_0001>
module attributes {stable_mosaic.version = 11 : i64} {
  func.func @_cell_kernel_fullk(%arg0: i32, %arg1: i32, %arg2: memref<8x256xf32, #tpu.memory_space<vmem>>, %arg3: memref<8x256xf32, #tpu.memory_space<vmem>>, %arg4: memref<256x256xf32, #tpu.memory_space<vmem>>, %arg5: memref<8x256xf32, #tpu.memory_space<vmem>>, %arg6: memref<8x256xf32, #tpu.memory_space<vmem>>) attributes {dimension_semantics = [#tpu.dimension_semantics<parallel>, #tpu.dimension_semantics<parallel>], iteration_bounds = array<i64: 1, 1>, scalar_prefetch = 0 : i64, scratch_operands = 0 : i64, tpu.core_type = #tpu.core_type<tc>, window_params = [{transform_indices = @transform_0, window_bounds = array<i64: 8, 256>}, {transform_indices = @transform_1, window_bounds = array<i64: 8, 256>}, {transform_indices = @transform_2, window_bounds = array<i64: 256, 256>}, {transform_indices = @transform_3, window_bounds = array<i64: 8, 256>}, {transform_indices = @transform_4, window_bounds = array<i64: 8, 256>}]} {
    %c0 = arith.constant 0 : index
    %c0_0 = arith.constant 0 : index
    %0 = vector.load %arg5[%c0, %c0_0] : memref<8x256xf32, #tpu.memory_space<vmem>>, vector<1x256xf32>
    %c1 = arith.constant 1 : index
    %c0_1 = arith.constant 0 : index
    %1 = vector.load %arg5[%c1, %c0_1] : memref<8x256xf32, #tpu.memory_space<vmem>>, vector<1x256xf32>
    %c0_2 = arith.constant 0 : index
    %c0_3 = arith.constant 0 : index
    %2 = vector.load %arg2[%c0_2, %c0_3] : memref<8x256xf32, #tpu.memory_space<vmem>>, vector<8x256xf32>
    %c0_4 = arith.constant 0 : index
    %c0_5 = arith.constant 0 : index
    %3 = vector.load %arg4[%c0_4, %c0_5] : memref<256x256xf32, #tpu.memory_space<vmem>>, vector<256x256xf32>
    %cst = arith.constant dense<0.000000e+00> : vector<8x256xf32>
    %4 = tpu.matmul %2, %3, %cst {dimension_numbers = #tpu.dot_dimension_numbers<[1], [0], [0], [1], [0, 0, 1, 1], [], []>} : vector<8x256xf32>, vector<256x256xf32>, vector<8x256xf32> -> vector<8x256xf32>
    %5 = vector.broadcast %1 : vector<1x256xf32> to vector<8x256xf32>
    %6 = arith.addf %4, %5 : vector<8x256xf32>
    %c0_6 = arith.constant 0 : index
    %c0_7 = arith.constant 0 : index
    %7 = vector.load %arg3[%c0_6, %c0_7] : memref<8x256xf32, #tpu.memory_space<vmem>>, vector<8x256xf32>
    %8 = vector.broadcast %0 : vector<1x256xf32> to vector<8x256xf32>
    %9 = arith.mulf %8, %7 : vector<8x256xf32>
    %10 = arith.addf %6, %9 : vector<8x256xf32>
    %cst_8 = arith.constant 0.000000e+00 : f32
    %11 = vector.broadcast %cst_8 : f32 to vector<8x256xf32>
    %12 = arith.maximumf %10, %11 : vector<8x256xf32>
    %c0_9 = arith.constant 0 : index
    %c0_10 = arith.constant 0 : index
    %13 = vector.load %arg6[%c0_9, %c0_10] : memref<8x256xf32, #tpu.memory_space<vmem>>, vector<8x256xf32>
    tpu.vector_store %arg6[%c0_9, %c0_10], %12 {strides = array<i32>} : memref<8x256xf32, #tpu.memory_space<vmem>>, vector<8x256xf32>,
    return
  }
  func.func @transform_0(%arg0: i32, %arg1: i32) -> (i32, i32) {
    %c0_i32 = arith.constant 0 : i32
    %c0_i32_0 = arith.constant 0 : i32
    return %arg0, %c0_i32 : i32, i32
  }
  func.func @transform_1(%arg0: i32, %arg1: i32) -> (i32, i32) {
    %c0_i32 = arith.constant 0 : i32
    return %arg0, %arg1 : i32, i32
  }
  func.func @transform_2(%arg0: i32, %arg1: i32) -> (i32, i32) {
    %c0_i32 = arith.constant 0 : i32
    %c0_i32_0 = arith.constant 0 : i32
    return %c0_i32, %arg1 : i32, i32
  }
  func.func @transform_3(%arg0: i32, %arg1: i32) -> (i32, i32) {
    %c0_i32 = arith.constant 0 : i32
    %c0_i32_0 = arith.constant 0 : i32
    return %c0_i32, %arg1 : i32, i32
  }
  func.func @transform_4(%arg0: i32, %arg1: i32) -> (i32, i32) {
    %c0_i32 = arith.constant 0 : i32
    return %arg0, %arg1 : i32, i32
  }
}

</mosaic_0001>

<bundles_post_ra>
// kernel: tpu_custom_call.1
= control target key start
LH: loop header
LB: loop body
LE: loop exit
PB: predicated region body
PF: predicated region fallthrough
CT: control target
= control target key end

     0   :  { %9 = vsyncpa [#allocation3], 0  ;;  %s418_s0 = inlined_call_operand.hbm [shape: f32[8,256], index: 0, kind: input, shape index: {}]   ;;  %s419_s1 = inlined_call_operand.hbm [shape: f32[8,256], index: 1, kind: input, shape index: {}]   ;;  %s420_s2 = inlined_call_operand.hbm [shape: f32[256,256], index: 2, kind: input, shape index: {}]   ;;  %s421_s3 = inlined_call_operand.hbm [shape: f32[8,256], index: 3, kind: input, shape index: {}]   ;;  %s422_s4 = inlined_call_operand.hbm [shape: f32[8,256], index: 4, kind: output, shape index: {}]  }
   0x1   :  { %10 = vsyncpa [#allocation6], 0 }
   0x2   :  { %11 = vsyncpa [#allocation9], 0 }
   0x3   :  { %12 = vsyncpa [#allocation4], 0  ;;  %s371_s15 = smov [#allocation5]   ;;  %s372_s17 = smov [#allocation2]  }
   0x4   :  { %s29_s16 = sshll.u32 %s371_s15, 4  ;;  %s19_s18 = sshll.u32 %s372_s17, 4  ;;  %s30_s16 = int_to_ptr.vmem [resolvable:$true] %s29_s16  ;;  %s20_s18 = int_to_ptr.vmem [resolvable:$true] %s19_s18 }
   0x5   :  { %s271_s19 = scalar_lea.vmem %s30_s16, 256  ;;  %p276_p1 = scmp.lt.s32.totalorder %s30_s16, %s30_s16 }
   0x6   :  { %p272_p0 = scmp.ne.s32.totalorder %s30_s16, %s271_s19  ;;  %p277_p2 = scmp.lt.s32.totalorder %s271_s19, %s271_s19 }
   0x8   :  { %p278_p3 = por %p277_p2, %p276_p1 }
   0xa   :  { %p279_p4 = pnand %p278_p3, %p272_p0 }
   0xc   :  { %282 = shalt.err (!%p279_p4)
}
   0xd   :  { %32 = dma.hbm_to_vmem [thread:$0]  %s419_s1, 256, %s30_s16, [#allocation6]  }
   0xe   :  { %s291_s22 = scalar_lea.vmem %s20_s18, 256  ;;  %p296_p6 = scmp.lt.s32.totalorder %s20_s18, %s20_s18 }
   0xf   :  { %p292_p5 = scmp.ne.s32.totalorder %s20_s18, %s291_s22  ;;  %p297_p7 = scmp.lt.s32.totalorder %s291_s22, %s291_s22 }
  0x11   :  { %p298_p8 = por %p297_p7, %p296_p6 }
  0x13   :  { %p299_p9 = pnand %p298_p8, %p292_p5 }
  0x15   :  { %302 = shalt.err (!%p299_p9)
}
  0x16   :  { %22 = dma.hbm_to_vmem [thread:$0]  %s418_s0, 256, %s20_s18, [#allocation3]  }
  0x17   :  { %s373_s25 = smov [#allocation7]  }
  0x18   :  { %s38_s26 = sshll.u32 %s373_s25, 4  ;;  %s39_s26 = int_to_ptr.vmem [resolvable:$true] %s38_s26 }
  0x19   :  { %s311_s27 = scalar_lea.vmem %s39_s26, 8192  ;;  %p316_p11 = scmp.lt.s32.totalorder %s39_s26, %s39_s26 }
  0x1a   :  { %p312_p10 = scmp.ne.s32.totalorder %s39_s26, %s311_s27  ;;  %p317_p12 = scmp.lt.s32.totalorder %s311_s27, %s311_s27 }
  0x1c   :  { %p318_p13 = por %p317_p12, %p316_p11 }
  0x1e   :  { %p319_p0 = pnand %p318_p13, %p312_p10 }
  0x20   :  { %322 = shalt.err (!%p319_p0)
}
  0x21   :  { %s374_s1 = smov 256   ;;  %s375_s28 = smov 16  }
  0x22   :  { %44 = dma.hbm_to_vmem [thread:$0]  %s420_s2, 8192, %s39_s26, [#allocation6], %s374_s1, %s374_s1, %s375_s28  }
  0x23   :  { %s376_s5 = smov [#allocation8]  }
  0x24   :  { %s51_s6 = sshll.u32 %s376_s5, 4  ;;  %s52_s6 = int_to_ptr.vmem [resolvable:$true] %s51_s6 }
  0x25   :  { %s331_s0 = scalar_lea.vmem %s52_s6, 256  ;;  %p336_p2 = scmp.lt.s32.totalorder %s52_s6, %s52_s6 }
  0x26   :  { %p332_p1 = scmp.ne.s32.totalorder %s52_s6, %s331_s0  ;;  %p337_p3 = scmp.lt.s32.totalorder %s331_s0, %s331_s0 }
  0x28   :  { %p338_p4 = por %p337_p3, %p336_p2 }
  0x2a   :  { %p339_p5 = pnand %p338_p4, %p332_p1 }
  0x2c   :  { %342 = shalt.err (!%p339_p5)
}
  0x2d   :  { %54 = dma.hbm_to_vmem [thread:$0]  %s421_s3, 256, %s52_s6, [#allocation9]  }
  0x2e   :  { %363 = dma.done.wait [#allocation3], 256  }
  0x2f   :  { %364 = vsyncadd [#allocation3], 4294967040 }
  0x30   :  { %365 = dma.done.wait [#allocation6], 8448  }
  0x31   :  { %366 = vsyncadd [#allocation6], 4294958848 }
  0x32   :  { %367 = dma.done.wait [#allocation9], 256  }
  0x33   :  { %368 = vsyncadd [#allocation9], 4294967040  ;;  %v103_v0 = vld [vmem:[#allocation7 + $0xf8] sm:$0xff]  ;;  %v102_v1 = vld [vmem:[#allocation7 + $0xf0] sm:$0xff]  ;;  %s377_s2 = smov [#allocation10]  }
  0x34   :  { %v101_v2 = vld [vmem:[#allocation7 + $0xe8] sm:$0xff]  ;;  %147 = vmatprep.subr.mxu0 %v103_v0  ;;  %v100_v3 = vld [vmem:[#allocation7 + $0xe0] sm:$0xff]  ;;  %v99_v4 = vld [vmem:[#allocation7 + $0xd8] sm:$0xff]  ;;  %s245_s3 = sshll.u32 %s377_s2, 4  ;;  %s246_s3 = int_to_ptr.vmem [resolvable:$true] %s245_s3 }
  0x35   :  { %148 = vmatpush1.msra.mxu0 %v102_v1  ;;  %v98_v5 = vld [vmem:[#allocation7 + $0xd0] sm:$0xff]  ;;  %v97_v6 = vld [vmem:[#allocation7 + $0xc8] sm:$0xff]  ;;  %v96_v7 = vld [vmem:[#allocation7 + $0xc0] sm:$0xff]  ;;  %s343_s9 = scalar_lea.vmem %s246_s3, 256  ;;  %p348_p7 = scmp.lt.s32.totalorder %s246_s3, %s246_s3 }
  0x36   :  { %149 = vmatprep.subr.mxu0 %v101_v2  ;;  %v95_v8 = vld [vmem:[#allocation7 + $0xb8] sm:$0xff]  ;;  %v94_v9 = vld [vmem:[#allocation7 + $0xb0] sm:$0xff]  ;;  %v93_v10 = vld [vmem:[#allocation7 + $0xa8] sm:$0xff]  ;;  %v137_v2 = vlaneseq  ;;  %p344_p6 = scmp.ne.s32.totalorder %s246_s3, %s343_s9  ;;  %p349_p8 = scmp.lt.s32.totalorder %s343_s9, %s343_s9 }
  0x37   :  { %150 = vmatpush1.msra.mxu0 %v100_v3  ;;  %v92_v11 = vld [vmem:[#allocation7 + $0xa0] sm:$0xff]  ;;  %v91_v12 = vld [vmem:[#allocation7 + $0x98] sm:$0xff]  ;;  %v90_v13 = vld [vmem:[#allocation7 + $0x90] sm:$0xff] }
  0x38   :  { %151 = vmatprep.subr.mxu0 %v99_v4  ;;  %v89_v14 = vld [vmem:[#allocation7 + $0x88] sm:$0xff]  ;;  %v88_v15 = vld [vmem:[#allocation7 + $0x80] sm:$0xff]  ;;  %v87_v16 = vld [vmem:[#allocation7 + $0x78] sm:$0xff]  ;;  %v138_v3 = vshrl.u32 %v137_v2, 7  ;;  %p350_p9 = por %p349_p8, %p348_p7 }
  0x39   :  { %152 = vmatpush1.msra.mxu0 %v98_v5  ;;  %v86_v17 = vld [vmem:[#allocation7 + $0x70] sm:$0xff]  ;;  %v85_v18 = vld [vmem:[#allocation7 + $0x68] sm:$0xff]  ;;  %v84_v19 = vld [vmem:[#allocation7 + $0x60] sm:$0xff] }
  0x3a   :  { %153 = vmatprep.subr.mxu0 %v97_v6  ;;  %v83_v20 = vld [vmem:[#allocation7 + $0x58] sm:$0xff]  ;;  %v82_v21 = vld [vmem:[#allocation7 + $0x50] sm:$0xff]  ;;  %v81_v22 = vld [vmem:[#allocation7 + $0x48] sm:$0xff]  ;;  %v139_v4 = vsub.s32 0, %v138_v3  ;;  %v143_v6 = vsub.s32 1, %v138_v3  ;;  %p351_p10 = pnand %p350_p9, %p344_p6 }
  0x3b   :  { %154 = vmatpush1.msra.mxu0 %v96_v7  ;;  %v80_v23 = vld [vmem:[#allocation7 + $0x40] sm:$0xff]  ;;  %v71_v24 = vld [vmem:[#allocation2 + $0x8] sm:$0xff]  ;;  %v79_v25 = vld [vmem:[#allocation7 + $0x38] sm:$0xff] }
  0x3c   :  { %155 = vmatprep.subr.mxu0 %v95_v8  ;;  %211 = vmatprep.mubr.f32.mxu0 %v71_v24  ;;  %v78_v26 = vld [vmem:[#allocation7 + $0x30] sm:$0xff]  ;;  %v77_v27 = vld [vmem:[#allocation7 + $0x28] sm:$0xff]  ;;  %v76_v28 = vld [vmem:[#allocation7 + $0x20] sm:$0xff] }
  0x3d   :  { %156 = vmatpush1.msra.mxu0 %v94_v9  ;;  %v75_v29 = vld [vmem:[#allocation7 + $0x18] sm:$0xff]  ;;  %v74_v30 = vld [vmem:[#allocation7 + $0x10] sm:$0xff]  ;;  %v73_v31 = vld [vmem:[#allocation7 + $0x8] sm:$0xff] }
  0x3e   :  { %157 = vmatprep.subr.mxu0 %v93_v10  ;;  %v72_v32 = vld [vmem:[#allocation7] sm:$0xff]  ;;  %v135_v33 = vld [vmem:[#allocation7 + $0x1f8] sm:$0xff]  ;;  %v134_v34 = vld [vmem:[#allocation7 + $0x1f0] sm:$0xff] }
  0x3f   :  { %158 = vmatpush1.msra.mxu0 %v92_v11  ;;  %v133_v35 = vld [vmem:[#allocation7 + $0x1e8] sm:$0xff]  ;;  %v132_v36 = vld [vmem:[#allocation7 + $0x1e0] sm:$0xff]  ;;  %v131_v37 = vld [vmem:[#allocation7 + $0x1d8] sm:$0xff] }
  0x40   :  { %159 = vmatprep.subr.mxu0 %v91_v12  ;;  %v130_v38 = vld [vmem:[#allocation7 + $0x1d0] sm:$0xff]  ;;  %v129_v39 = vld [vmem:[#allocation7 + $0x1c8] sm:$0xff]  ;;  %v128_v40 = vld [vmem:[#allocation7 + $0x1c0] sm:$0xff] }
  0x41   :  { %160 = vmatpush1.msra.mxu0 %v90_v13  ;;  %v127_v41 = vld [vmem:[#allocation7 + $0x1b8] sm:$0xff]  ;;  %v126_v42 = vld [vmem:[#allocation7 + $0x1b0] sm:$0xff]  ;;  %v125_v43 = vld [vmem:[#allocation7 + $0x1a8] sm:$0xff] }
  0x42   :  { %161 = vmatprep.subr.mxu0 %v89_v14  ;;  %v124_v44 = vld [vmem:[#allocation7 + $0x1a0] sm:$0xff]  ;;  %v123_v45 = vld [vmem:[#allocation7 + $0x198] sm:$0xff]  ;;  %v122_v46 = vld [vmem:[#allocation7 + $0x190] sm:$0xff] }
  0x43   :  { %162 = vmatpush1.msra.mxu0 %v88_v15  ;;  %v121_v47 = vld [vmem:[#allocation7 + $0x188] sm:$0xff]  ;;  %v120_v48 = vld [vmem:[#allocation7 + $0x180] sm:$0xff]  ;;  %v119_v49 = vld [vmem:[#allocation7 + $0x178] sm:$0xff] }
  0x44   :  { %163 = vmatprep.subr.mxu0 %v87_v16  ;;  %v118_v50 = vld [vmem:[#allocation7 + $0x170] sm:$0xff]  ;;  %v117_v51 = vld [vmem:[#allocation7 + $0x168] sm:$0xff]  ;;  %v116_v52 = vld [vmem:[#allocation7 + $0x160] sm:$0xff] }
  0x45   :  { %164 = vmatpush1.msra.mxu0 %v86_v17  ;;  %v115_v53 = vld [vmem:[#allocation7 + $0x158] sm:$0xff]  ;;  %v114_v54 = vld [vmem:[#allocation7 + $0x150] sm:$0xff]  ;;  %v113_v55 = vld [vmem:[#allocation7 + $0x148] sm:$0xff] }
  0x46   :  { %165 = vmatprep.subr.mxu0 %v85_v18  ;;  %v112_v56 = vld [vmem:[#allocation7 + $0x140] sm:$0xff]  ;;  %v111_v57 = vld [vmem:[#allocation7 + $0x138] sm:$0xff]  ;;  %v110_v58 = vld [vmem:[#allocation7 + $0x130] sm:$0xff] }
  0x47   :  { %166 = vmatpush1.msra.mxu0 %v84_v19  ;;  %v109_v59 = vld [vmem:[#allocation7 + $0x128] sm:$0xff]  ;;  %v108_v60 = vld [vmem:[#allocation7 + $0x120] sm:$0xff]  ;;  %v107_v61 = vld [vmem:[#allocation7 + $0x118] sm:$0xff] }
  0x48   :  { %167 = vmatprep.subr.mxu0 %v83_v20  ;;  %v106_v62 = vld [vmem:[#allocation7 + $0x110] sm:$0xff]  ;;  %v105_v63 = vld [vmem:[#allocation7 + $0x108] sm:$0xff]  ;;  %v104_v0 = vld [vmem:[#allocation7 + $0x100] sm:$0xff] }
  0x49   :  { %168 = vmatpush1.msra.mxu0 %v82_v21  ;;  %v70_v1 = vld [vmem:[#allocation2] sm:$0xff]  ;;  %v218_v9 = vld [vmem:[#allocation5] sm:$0xff]  ;;  %v219_v12 = vld [vmem:[#allocation5 + $0x8] sm:$0xff] }
  0x4a   :  { %169 = vmatprep.subr.mxu0 %v81_v22  ;;  %v67_v5 = vld [vmem:[#allocation8] ss:$8 sm:$0x3]  ;;  %v69_v7 = vld [vmem:[#allocation8 + $0x1] ss:$8 sm:$0x3] }
  0x4b   :  { %170 = vmatpush1.msra.mxu0 %v80_v23  ;;  %v224_v8 = vrot.slane %v67_v5, %v139_v4  ;;  %v140_v10 = vrot.slane %v69_v7, %v139_v4  ;;  %v228_v11 = vrot.slane %v67_v5, %v143_v6  ;;  %v144_v14 = vrot.slane %v69_v7, %v143_v6 }
  0x4c   :  { %171 = vmatprep.subr.mxu0 %v79_v25 }
  0x4d   :  { %172 = vmatpush1.msra.mxu0 %v78_v26  ;;  %v231_v13 = vmul.f32 %v224_v8, %v218_v9  ;;  %v232_v17 = vmul.f32 %v228_v11, %v219_v12 }
  0x4e   :  { %173 = vmatprep.subr.mxu0 %v77_v27 }
  0x4f   :  { %174 = vmatpush1.msra.mxu0 %v76_v28 }
  0x50   :  { %175 = vmatprep.subr.mxu0 %v75_v29 }
  0x51   :  { %176 = vmatpush1.msra.mxu0 %v74_v30 }
  0x52   :  { %177 = vmatprep.subr.mxu0 %v73_v31 }
  0x53   :  { %178 = vmatpush1.msra.mxu0 %v72_v32 }
  0x54   :  { %179 = vmatprep.subr.mxu0 %v135_v33 }
  0x55   :  { %180 = vmatpush2.msra.mxu0 %v134_v34 }
  0x56   :  { %181 = vmatprep.subr.mxu0 %v133_v35 }
  0x57   :  { %182 = vmatpush2.msra.mxu0 %v132_v36 }
  0x58   :  { %183 = vmatprep.subr.mxu0 %v131_v37 }
  0x59   :  { %184 = vmatpush2.msra.mxu0 %v130_v38 }
  0x5a   :  { %185 = vmatprep.subr.mxu0 %v129_v39 }
  0x5b   :  { %186 = vmatpush2.msra.mxu0 %v128_v40 }
  0x5c   :  { %187 = vmatprep.subr.mxu0 %v127_v41 }
  0x5d   :  { %188 = vmatpush2.msra.mxu0 %v126_v42 }
  0x5e   :  { %189 = vmatprep.subr.mxu0 %v125_v43 }
  0x5f   :  { %190 = vmatpush2.msra.mxu0 %v124_v44 }
  0x60   :  { %191 = vmatprep.subr.mxu0 %v123_v45 }
  0x61   :  { %192 = vmatpush2.msra.mxu0 %v122_v46 }
  0x62   :  { %193 = vmatprep.subr.mxu0 %v121_v47 }
  0x63   :  { %194 = vmatpush2.msra.mxu0 %v120_v48 }
  0x64   :  { %195 = vmatprep.subr.mxu0 %v119_v49 }
  0x65   :  { %196 = vmatpush2.msra.mxu0 %v118_v50 }
  0x66   :  { %197 = vmatprep.subr.mxu0 %v117_v51 }
  0x67   :  { %198 = vmatpush2.msra.mxu0 %v116_v52 }
  0x68   :  { %199 = vmatprep.subr.mxu0 %v115_v53 }
  0x69   :  { %200 = vmatpush2.msra.mxu0 %v114_v54 }
  0x6a   :  { %201 = vmatprep.subr.mxu0 %v113_v55 }
  0x6b   :  { %202 = vmatpush2.msra.mxu0 %v112_v56 }
  0x6c   :  { %203 = vmatprep.subr.mxu0 %v111_v57 }
  0x6d   :  { %204 = vmatpush2.msra.mxu0 %v110_v58 }
  0x6e   :  { %205 = vmatprep.subr.mxu0 %v109_v59 }
  0x6f   :  { %206 = vmatpush2.msra.mxu0 %v108_v60 }
  0x70   :  { %207 = vmatprep.subr.mxu0 %v107_v61 }
  0x71   :  { %208 = vmatpush2.msra.mxu0 %v106_v62 }
  0x72   :  { %209 = vmatprep.subr.mxu0 %v105_v63 }
  0x73   :  { %210 = vmatpush2.msra.mxu0 %v104_v0 }
  0x74   :  { %212 = vmatmul.mubr.f32.vlgmr.msra.gmra.mxu0 %v70_v1 }
 0x134   :  { %v213_v15 = vpop.f32.mrf.mxu0 }
 0x135   :  { %v214_v16 = vadd.f32 %v213_v15, %v140_v10 }
 0x136   :  { %v215_v18 = vpop.f32.mrf.mxu0 }
 0x137   :  { %v233_v19 = vadd.f32 %v231_v13, %v214_v16  ;;  %v216_v20 = vadd.f32 %v215_v18, %v144_v14 }
 0x139   :  { %v235_v21 = vmax.f32 %v233_v19, 0.0  ;;  %v234_v22 = vadd.f32 %v232_v17, %v216_v20 }
 0x13b   :  { %237 = vst [vmem:[#allocation10] sm:$0xff] %v235_v21  ;;  %v236_v23 = vmax.f32 %v234_v22, 0.0 }
 0x13d   :  { %238 = vst [vmem:[#allocation10 + $0x8] sm:$0xff] %v236_v23 }
 0x13e   :  { %354 = shalt.err (!%p351_p10)
}
 0x13f   :  { %248 = dma.vmem_to_hbm [thread:$0]  %s246_s3, 256, %s422_s4, [#allocation4]  }
 0x140   :  { %369 = dma.done.wait [#allocation4], 256  }
 0x141   :  { %370 = vsyncadd [#allocation4], 4294967040 }
 0x142   :  { %252 = vsyncpa [#allocation3], 1 }
 0x143   :  { %253 = vsyncpa [#allocation6], 1 }
 0x144   :  { %254 = vsyncpa [#allocation9], 1 }
 0x145   :  { %255 = vsyncpa [#allocation4], 1 }

</bundles_post_ra>
